<compile_context>
chip_gen: v6e
topology: v6e:2x2x1
jax: 0.10.0
libtpu: 0.0.40
codegen_flags: <defaults>
</compile_context>

<pallas_src>
import jax
import jax.numpy as jnp
from jax.experimental import pallas as pl
from jax.experimental.pallas import tpu as pltpu


def _round_up(x: int, m: int) -> int:
    return ((x + m - 1) // m) * m


def _hw_params():
    """(vmem_cap_bytes, num_tensorcores, mxu_align) for the local TPU generation."""
    kind = ""
    try:
        kind = jax.devices()[0].device_kind.lower()
    except Exception:
        pass
    if "7" in kind:                      # v7x: 64 MiB/TC, 2 TCs/chip, 2x256^2 MXU
        vmem_cap, num_tc, mxu_align = 52 * 2**20, 2, 256
    elif "v5" in kind:                   # v5e: 128 MiB, 1 TC, 4x128^2 MXU
        vmem_cap, num_tc, mxu_align = 96 * 2**20, 1, 128
    else:                                # v6e / default: 128 MiB, 1 TC, 2x256^2 MXU
        vmem_cap, num_tc, mxu_align = 96 * 2**20, 1, 256
    try:
        info = pltpu.get_tpu_info()
        phys = getattr(info, "vmem_capacity_bytes", None)
        if phys:
            vmem_cap = min(vmem_cap, int(phys * 0.85))
    except Exception:
        pass
    return vmem_cap, num_tc, mxu_align


# --------------------------------------------------------------------------- kernels
def _ffn_kernel_resident(x_ref, w1_ref, b1_ref, w2_ref, b2_ref, o_ref):
    # x_ref: (tm, D) input tile (original dtype) ; weights resident in VMEM.
    x = x_ref[...].astype(w1_ref.dtype)                       # cast tile in-kernel
    h = jnp.dot(x, w1_ref[...], preferred_element_type=jnp.float32)
    h = jnp.maximum(h + b1_ref[...], 0.0)
    y = jnp.dot(h.astype(w2_ref.dtype), w2_ref[...],
                preferred_element_type=jnp.float32)
    o_ref[...] = (y + b2_ref[...]).astype(o_ref.dtype)


def _ffn_kernel_chunked(x_ref, w1_ref, b1_ref, w2_ref, b2_ref, o_ref, acc_ref):
    # Hidden dimension streamed in chunks along grid axis 1 ("arbitrary").
    k = pl.program_id(1)

    @pl.when(k == 0)
    def _init():
        # Seed the accumulator with b2 -> no extra bias add in the epilogue.
        acc_ref[...] = jnp.broadcast_to(b2_ref[...], acc_ref.shape)

    x = x_ref[...].astype(w1_ref.dtype)
    h = jnp.dot(x, w1_ref[...], preferred_element_type=jnp.float32)
    h = jnp.maximum(h + b1_ref[...], 0.0)
    acc_ref[...] += jnp.dot(h.astype(w2_ref.dtype), w2_ref[...],
                            preferred_element_type=jnp.float32)

    @pl.when(k == pl.num_programs(1) - 1)
    def _finalize():
        o_ref[...] = acc_ref[...].astype(o_ref.dtype)


# --------------------------------------------------------------------------- wrapper
def prepare_ffn_params(w1, b1, w2, b2, compute_dtype=jnp.bfloat16):
    """One-time weight prep (transpose + cast). Do this once, reuse per forward."""
    compute_dtype = jnp.dtype(compute_dtype)
    return (w1.T.astype(compute_dtype),                # (D, H)
            b1.reshape(1, -1).astype(jnp.float32),     # (1, H)
            w2.T.astype(compute_dtype),                # (H, D)
            b2.reshape(1, -1).astype(jnp.float32))     # (1, D)


def position_wise_feed_forward(x, w1, b1, w2, b2, *, tm=1024, th=512,
                               compute_dtype=jnp.bfloat16):
    """x : (N, S, d_model)
       w1: (hidden, d_model) = Conv1d(D, H, 1).weight[:, :, 0],  b1: (hidden,)
       w2: (d_model, hidden) = Conv1d(H, D, 1).weight[:, :, 0],  b2: (d_model,)
       compute_dtype: MXU operand dtype (accumulation is always f32)."""
    N, S, D = x.shape
    H = w1.shape[0]
    M = N * S
    out_dtype = x.dtype
    compute_dtype = jnp.dtype(compute_dtype)

    # TODO(synk): in a real model call prepare_ffn_params once at init and reuse the
    # prepared (pre-transposed, pre-cast) params instead of re-doing it per forward.
    w1_t, b1_2d, w2_t, b2_2d = prepare_ffn_params(w1, b1, w2, b2, compute_dtype)

    vmem_cap, num_tc, mxu_align = _hw_params()
    csize = compute_dtype.itemsize
    xsize = jnp.dtype(x.dtype).itemsize
    osize = jnp.dtype(out_dtype).itemsize
    sub = {1: 32, 2: 16}.get(csize, 8)       # minimum efficient sublane multiple

    # ---------- row (token) tile ----------
    tm0 = max(sub, min(int(tm), _round_up(M, sub)))
    tm0 = _round_up(tm0, sub)
    if num_tc > 1:                           # keep every TensorCore busy (v7x megacore)
        while (M + tm0 - 1) // tm0 < num_tc and tm0 > sub:
            tm0 = _round_up(max(sub, tm0 // 2), sub)

    def resident_bytes(tm_, wbuf):
        return (2 * tm_ * D * xsize + 2 * tm_ * D * osize
                + wbuf * 2 * D * H * csize
                + wbuf * 8 * (_round_up(H, 128) + _round_up(D, 128)) * 4
                + tm_ * _round_up(H, 128) * 4          # f32 hidden temp
                + tm_ * D * 4)                         # f32 output temp

    def chunked_bytes(tm_, th_):
        return (2 * tm_ * D * xsize + 2 * tm_ * D * osize
                + 2 * 2 * D * th_ * csize
                + 2 * 8 * (th_ + _round_up(D, 128)) * 4
                + tm_ * D * 4                          # f32 accumulator scratch
                + tm_ * th_ * 4 + tm_ * D * 4)         # f32 temps

    SAFETY = 1.25

    # ---------- choose resident-weights fast path vs hidden-chunk streaming ----------
    use_resident, tm_sel, t = False, tm0, tm0
    while True:
        if resident_bytes(t, 2) * SAFETY <= vmem_cap:
            use_resident, tm_sel = True, t
            break
        if t <= 256 or t <= sub:
            break
        t = _round_up(max(sub, t // 2), sub)

    if use_resident:
        tm = tm_sel
        th_sel = H
        H_pad = H
    else:
        tm = tm0
        th_sel = min(_round_up(int(th), mxu_align), _round_up(H, mxu_align))
        while chunked_bytes(tm, th_sel) * SAFETY > vmem_cap and th_sel > mxu_align:
            th_sel = _round_up(max(mxu_align, th_sel // 2), mxu_align)
        while chunked_bytes(tm, th_sel) * SAFETY > vmem_cap and tm > sub:
            tm = _round_up(max(sub, tm // 2), sub)
        H_pad = _round_up(H, th_sel)

    M_pad = _round_up(M, tm)
    rows = M_pad // tm

    x2d = x.reshape(M, D)
    if M_pad != M:
        x2d = jnp.pad(x2d, ((0, M_pad - M), (0, 0)))   # padded rows sliced off below

    # ------------------------------------------------------------------ fast path
    def call_resident(use_buffered):
        def wspec(shape):
            if use_buffered:
                return pl.BlockSpec(shape, lambda i: (0, 0),
                                    pipeline_mode=pl.Buffered(1))
            return pl.BlockSpec(shape, lambda i: (0, 0))

        budget = resident_bytes(tm, 1 if use_buffered else 2)
        vmem_limit = int(min(vmem_cap, max(32 * 2**20, int(budget * 1.4))))
        cost = pl.CostEstimate(
            flops=int(4 * M_pad * D * H),
            transcendentals=0,
            bytes_accessed=int(M_pad * D * (xsize + osize)
                               + 2 * D * H * csize + (H + D) * 4))
        return pl.pallas_call(
            _ffn_kernel_resident,
            out_shape=jax.ShapeDtypeStruct((M_pad, D), out_dtype),
            grid_spec=pltpu.PrefetchScalarGridSpec(
                num_scalar_prefetch=0,
                grid=(rows,),
                in_specs=[
                    pl.BlockSpec((tm, D), lambda i: (i, 0)),   # x row tile
                    wspec((D, H)),                             # W1^T  (resident)
                    wspec((1, H)),                             # b1    (resident)
                    wspec((H, D)),                             # W2^T  (resident)
                    wspec((1, D)),                             # b2    (resident)
                ],
                out_specs=pl.BlockSpec((tm, D), lambda i: (i, 0)),
            ),
            compiler_params=pltpu.CompilerParams(
                dimension_semantics=("parallel",),
                vmem_limit_bytes=vmem_limit),
            cost_estimate=cost,
        )(x2d, w1_t, b1_2d, w2_t, b2_2d)

    # ------------------------------------------------------------------ fallback path
    def call_chunked():
        w1p, b1p, w2p = w1_t, b1_2d, w2_t
        if H_pad != H:
            w1p = jnp.pad(w1p, ((0, 0), (0, H_pad - H)))
            b1p = jnp.pad(b1p, ((0, 0), (0, H_pad - H)))
            w2p = jnp.pad(w2p, ((0, H_pad - H), (0, 0)))
        budget = chunked_bytes(tm, th_sel)
        vmem_limit = int(min(vmem_cap, max(32 * 2**20, int(budget * 1.4))))
        cost = pl.CostEstimate(
            flops=int(4 * M_pad * D * H_pad),
            transcendentals=0,
            bytes_accessed=int(M_pad * D * (xsize + osize)
                               + rows * 2 * D * H_pad * csize   # weights re-streamed
                               + (H_pad + D) * 4))
        return pl.pallas_call(
            _ffn_kernel_chunked,
            out_shape=jax.ShapeDtypeStruct((M_pad, D), out_dtype),
            grid_spec=pltpu.PrefetchScalarGridSpec(
                num_scalar_prefetch=0,
                grid=(rows, H_pad // th_sel),
                in_specs=[
                    pl.BlockSpec((tm, D), lambda i, k: (i, 0)),      # x row tile
                    pl.BlockSpec((D, th_sel), lambda i, k: (0, k)),  # W1^T chunk
                    pl.BlockSpec((1, th_sel), lambda i, k: (0, k)),  # b1 chunk
                    pl.BlockSpec((th_sel, D), lambda i, k: (k, 0)),  # W2^T chunk
                    pl.BlockSpec((1, D), lambda i, k: (0, 0)),       # b2
                ],
                out_specs=pl.BlockSpec((tm, D), lambda i, k: (i, 0)),
                scratch_shapes=[pltpu.VMEM((tm, D), jnp.float32)],
            ),
            compiler_params=pltpu.CompilerParams(
                dimension_semantics=("parallel", "arbitrary"),
                vmem_limit_bytes=vmem_limit),
            cost_estimate=cost,
        )(x2d, w1p, b1p, w2p, b2_2d)

    if use_resident:
        try:
            out2d = call_resident(True)        # single-buffered resident weights
        except Exception:
            out2d = call_resident(False)       # older jax: no pipeline_mode/Buffered
    else:
        out2d = call_chunked()

    return out2d[:M].reshape(N, S, D)


# --------------------------------------------------------------------------- demo
if __name__ == "__main__":
    # Small shapes consistent with the module: [N, seq_len, d_model], expansion=2.
    N, S, D = 2, 8, 32
    expansion = 2
    H = D * expansion

    key = jax.random.PRNGKey(0)
    kx, k1, kb1, k2, kb2 = jax.random.split(key, 5)

    x = jax.random.normal(kx, (N, S, D), dtype=jnp.float32)
    # Synthetic Conv1d(kernel_size=1) parameters (weight[:, :, 0]).
    w1 = jax.random.normal(k1, (H, D), dtype=jnp.float32) * 0.1
    b1 = jax.random.normal(kb1, (H,), dtype=jnp.float32) * 0.1
    w2 = jax.random.normal(k2, (D, H), dtype=jnp.float32) * 0.1
    b2 = jax.random.normal(kb2, (D,), dtype=jnp.float32) * 0.1

    # Pure-JAX reference (per-position MLP == 1x1 Conv1d stack), full precision.
    hp = jax.lax.Precision.HIGHEST
    ref = jnp.maximum(jnp.einsum("nsd,hd->nsh", x, w1, precision=hp) + b1, 0.0)
    ref = jnp.einsum("nsh,dh->nsd", ref, w2, precision=hp) + b2

    # f32 MXU operands: close match to the reference.
    out_f32 = jax.block_until_ready(
        position_wise_feed_forward(x, w1, b1, w2, b2, compute_dtype=jnp.float32))
    assert out_f32.shape == (N, S, D)
    assert jnp.allclose(out_f32, ref, atol=5e-3, rtol=5e-3), \
        float(jnp.max(jnp.abs(out_f32 - ref)))

    # Default path: bf16 MXU operands with f32 accumulation (hot path for real sizes).
    out_bf16 = jax.block_until_ready(position_wise_feed_forward(x, w1, b1, w2, b2))
    assert out_bf16.shape == (N, S, D)
    assert jnp.allclose(out_bf16, ref, atol=5e-2, rtol=5e-2), \
        float(jnp.max(jnp.abs(out_bf16 - ref)))

    print("KERNEL_OK")
</pallas_src>

<mosaic_0001>
module attributes {stable_mosaic.version = 11 : i64} {
  func.func @_ffn_kernel_resident(%arg0: i32, %arg1: memref<16x32xf32, #tpu.memory_space<vmem>>, %arg2: memref<32x64xf32, #tpu.memory_space<vmem>>, %arg3: memref<1x64xf32, #tpu.memory_space<vmem>>, %arg4: memref<64x32xf32, #tpu.memory_space<vmem>>, %arg5: memref<1x32xf32, #tpu.memory_space<vmem>>, %arg6: memref<16x32xf32, #tpu.memory_space<vmem>>) attributes {dimension_semantics = [#tpu.dimension_semantics<parallel>], iteration_bounds = array<i64: 1>, scalar_prefetch = 0 : i64, scratch_operands = 0 : i64, tpu.core_type = #tpu.core_type<tc>, window_params = [{transform_indices = @transform_0, window_bounds = array<i64: 16, 32>}, {pipeline_mode = #tpu.pipeline_mode<synchronous>, transform_indices = @transform_1, window_bounds = array<i64: 32, 64>}, {pipeline_mode = #tpu.pipeline_mode<synchronous>, transform_indices = @transform_2, window_bounds = array<i64: 1, 64>}, {pipeline_mode = #tpu.pipeline_mode<synchronous>, transform_indices = @transform_3, window_bounds = array<i64: 64, 32>}, {pipeline_mode = #tpu.pipeline_mode<synchronous>, transform_indices = @transform_4, window_bounds = array<i64: 1, 32>}, {transform_indices = @transform_5, window_bounds = array<i64: 16, 32>}]} {
    %c0 = arith.constant 0 : index
    %c0_0 = arith.constant 0 : index
    %0 = vector.load %arg1[%c0, %c0_0] : memref<16x32xf32, #tpu.memory_space<vmem>>, vector<16x32xf32>
    %c0_1 = arith.constant 0 : index
    %c0_2 = arith.constant 0 : index
    %1 = vector.load %arg2[%c0_1, %c0_2] : memref<32x64xf32, #tpu.memory_space<vmem>>, vector<32x64xf32>
    %cst = arith.constant dense<0.000000e+00> : vector<16x64xf32>
    %2 = tpu.matmul %0, %1, %cst {dimension_numbers = #tpu.dot_dimension_numbers<[1], [0], [0], [1], [0, 0, 1, 1], [], []>} : vector<16x32xf32>, vector<32x64xf32>, vector<16x64xf32> -> vector<16x64xf32>
    %c0_3 = arith.constant 0 : index
    %c0_4 = arith.constant 0 : index
    %3 = vector.load %arg3[%c0_3, %c0_4] : memref<1x64xf32, #tpu.memory_space<vmem>>, vector<1x64xf32>
    %4 = vector.broadcast %3 : vector<1x64xf32> to vector<16x64xf32>
    %5 = arith.addf %2, %4 : vector<16x64xf32>
    %cst_5 = arith.constant 0.000000e+00 : f32
    %6 = vector.broadcast %cst_5 : f32 to vector<16x64xf32>
    %7 = arith.maximumf %5, %6 : vector<16x64xf32>
    %c0_6 = arith.constant 0 : index
    %c0_7 = arith.constant 0 : index
    %8 = vector.load %arg4[%c0_6, %c0_7] : memref<64x32xf32, #tpu.memory_space<vmem>>, vector<64x32xf32>
    %cst_8 = arith.constant dense<0.000000e+00> : vector<16x32xf32>
    %9 = tpu.matmul %7, %8, %cst_8 {dimension_numbers = #tpu.dot_dimension_numbers<[1], [0], [0], [1], [0, 0, 1, 1], [], []>} : vector<16x64xf32>, vector<64x32xf32>, vector<16x32xf32> -> vector<16x32xf32>
    %c0_9 = arith.constant 0 : index
    %c0_10 = arith.constant 0 : index
    %10 = vector.load %arg5[%c0_9, %c0_10] : memref<1x32xf32, #tpu.memory_space<vmem>>, vector<1x32xf32>
    %11 = vector.broadcast %10 : vector<1x32xf32> to vector<16x32xf32>
    %12 = arith.addf %9, %11 : vector<16x32xf32>
    %c0_11 = arith.constant 0 : index
    %c0_12 = arith.constant 0 : index
    %13 = vector.load %arg6[%c0_11, %c0_12] : memref<16x32xf32, #tpu.memory_space<vmem>>, vector<16x32xf32>
    tpu.vector_store %arg6[%c0_11, %c0_12], %12 {strides = array<i32>} : memref<16x32xf32, #tpu.memory_space<vmem>>, vector<16x32xf32>,
    return
  }
  func.func @transform_0(%arg0: i32) -> (i32, i32) {
    %c0_i32 = arith.constant 0 : i32
    %c0_i32_0 = arith.constant 0 : i32
    return %arg0, %c0_i32 : i32, i32
  }
  func.func @transform_1(%arg0: i32) -> (i32, i32) {
    %c0_i32 = arith.constant 0 : i32
    %c0_i32_0 = arith.constant 0 : i32
    %c0_i32_1 = arith.constant 0 : i32
    return %c0_i32, %c0_i32_0 : i32, i32
  }
  func.func @transform_2(%arg0: i32) -> (i32, i32) {
    %c0_i32 = arith.constant 0 : i32
    %c0_i32_0 = arith.constant 0 : i32
    %c0_i32_1 = arith.constant 0 : i32
    return %c0_i32, %c0_i32_0 : i32, i32
  }
  func.func @transform_3(%arg0: i32) -> (i32, i32) {
    %c0_i32 = arith.constant 0 : i32
    %c0_i32_0 = arith.constant 0 : i32
    %c0_i32_1 = arith.constant 0 : i32
    return %c0_i32, %c0_i32_0 : i32, i32
  }
  func.func @transform_4(%arg0: i32) -> (i32, i32) {
    %c0_i32 = arith.constant 0 : i32
    %c0_i32_0 = arith.constant 0 : i32
    %c0_i32_1 = arith.constant 0 : i32
    return %c0_i32, %c0_i32_0 : i32, i32
  }
  func.func @transform_5(%arg0: i32) -> (i32, i32) {
    %c0_i32 = arith.constant 0 : i32
    %c0_i32_0 = arith.constant 0 : i32
    return %arg0, %c0_i32 : i32, i32
  }
}

module attributes {stable_mosaic.version = 11 : i64} {
  func.func @_ffn_kernel_resident(%arg0: i32, %arg1: memref<16x32xf32, #tpu.memory_space<vmem>>, %arg2: memref<32x64xf32, #tpu.memory_space<vmem>>, %arg3: memref<1x64xf32, #tpu.memory_space<vmem>>, %arg4: memref<64x32xf32, #tpu.memory_space<vmem>>, %arg5: memref<1x32xf32, #tpu.memory_space<vmem>>, %arg6: memref<16x32xf32, #tpu.memory_space<vmem>>) attributes {dimension_semantics = [#tpu.dimension_semantics<parallel>], iteration_bounds = array<i64: 1>, scalar_prefetch = 0 : i64, scratch_operands = 0 : i64, tpu.core_type = #tpu.core_type<tc>, window_params = [{transform_indices = @transform_0, window_bounds = array<i64: 16, 32>}, {pipeline_mode = #tpu.pipeline_mode<synchronous>, transform_indices = @transform_1, window_bounds = array<i64: 32, 64>}, {pipeline_mode = #tpu.pipeline_mode<synchronous>, transform_indices = @transform_2, window_bounds = array<i64: 1, 64>}, {pipeline_mode = #tpu.pipeline_mode<synchronous>, transform_indices = @transform_3, window_bounds = array<i64: 64, 32>}, {pipeline_mode = #tpu.pipeline_mode<synchronous>, transform_indices = @transform_4, window_bounds = array<i64: 1, 32>}, {transform_indices = @transform_5, window_bounds = array<i64: 16, 32>}]} {
    %c0 = arith.constant 0 : index
    %c0_0 = arith.constant 0 : index
    %0 = vector.load %arg1[%c0, %c0_0] : memref<16x32xf32, #tpu.memory_space<vmem>>, vector<16x32xf32>
    %c0_1 = arith.constant 0 : index
    %c0_2 = arith.constant 0 : index
    %1 = vector.load %arg2[%c0_1, %c0_2] : memref<32x64xf32, #tpu.memory_space<vmem>>, vector<32x64xf32>
    %cst = arith.constant dense<0.000000e+00> : vector<16x64xf32>
    %2 = tpu.matmul %0, %1, %cst {dimension_numbers = #tpu.dot_dimension_numbers<[1], [0], [0], [1], [0, 0, 1, 1], [], []>} : vector<16x32xf32>, vector<32x64xf32>, vector<16x64xf32> -> vector<16x64xf32>
    %c0_3 = arith.constant 0 : index
    %c0_4 = arith.constant 0 : index
    %3 = vector.load %arg3[%c0_3, %c0_4] : memref<1x64xf32, #tpu.memory_space<vmem>>, vector<1x64xf32>
    %4 = vector.broadcast %3 : vector<1x64xf32> to vector<16x64xf32>
    %5 = arith.addf %2, %4 : vector<16x64xf32>
    %cst_5 = arith.constant 0.000000e+00 : f32
    %6 = vector.broadcast %cst_5 : f32 to vector<16x64xf32>
    %7 = arith.maximumf %5, %6 : vector<16x64xf32>
    %c0_6 = arith.constant 0 : index
    %c0_7 = arith.constant 0 : index
    %8 = vector.load %arg4[%c0_6, %c0_7] : memref<64x32xf32, #tpu.memory_space<vmem>>, vector<64x32xf32>
    %cst_8 = arith.constant dense<0.000000e+00> : vector<16x32xf32>
    %9 = tpu.matmul %7, %8, %cst_8 {dimension_numbers = #tpu.dot_dimension_numbers<[1], [0], [0], [1], [0, 0, 1, 1], [], []>} : vector<16x64xf32>, vector<64x32xf32>, vector<16x32xf32> -> vector<16x32xf32>
    %c0_9 = arith.constant 0 : index
    %c0_10 = arith.constant 0 : index
    %10 = vector.load %arg5[%c0_9, %c0_10] : memref<1x32xf32, #tpu.memory_space<vmem>>, vector<1x32xf32>
    %11 = vector.broadcast %10 : vector<1x32xf32> to vector<16x32xf32>
    %12 = arith.addf %9, %11 : vector<16x32xf32>
    %c0_11 = arith.constant 0 : index
    %c0_12 = arith.constant 0 : index
    %13 = vector.load %arg6[%c0_11, %c0_12] : memref<16x32xf32, #tpu.memory_space<vmem>>, vector<16x32xf32>
    tpu.vector_store %arg6[%c0_11, %c0_12], %12 {strides = array<i32>} : memref<16x32xf32, #tpu.memory_space<vmem>>, vector<16x32xf32>,
    return
  }
  func.func @transform_0(%arg0: i32) -> (i32, i32) {
    %c0_i32 = arith.constant 0 : i32
    %c0_i32_0 = arith.constant 0 : i32
    return %arg0, %c0_i32 : i32, i32
  }
  func.func @transform_1(%arg0: i32) -> (i32, i32) {
    %c0_i32 = arith.constant 0 : i32
    %c0_i32_0 = arith.constant 0 : i32
    %c0_i32_1 = arith.constant 0 : i32
    return %c0_i32, %c0_i32_0 : i32, i32
  }
  func.func @transform_2(%arg0: i32) -> (i32, i32) {
    %c0_i32 = arith.constant 0 : i32
    %c0_i32_0 = arith.constant 0 : i32
    %c0_i32_1 = arith.constant 0 : i32
    return %c0_i32, %c0_i32_0 : i32, i32
  }
  func.func @transform_3(%arg0: i32) -> (i32, i32) {
    %c0_i32 = arith.constant 0 : i32
    %c0_i32_0 = arith.constant 0 : i32
    %c0_i32_1 = arith.constant 0 : i32
    return %c0_i32, %c0_i32_0 : i32, i32
  }
  func.func @transform_4(%arg0: i32) -> (i32, i32) {
    %c0_i32 = arith.constant 0 : i32
    %c0_i32_0 = arith.constant 0 : i32
    %c0_i32_1 = arith.constant 0 : i32
    return %c0_i32, %c0_i32_0 : i32, i32
  }
  func.func @transform_5(%arg0: i32) -> (i32, i32) {
    %c0_i32 = arith.constant 0 : i32
    %c0_i32_0 = arith.constant 0 : i32
    return %arg0, %c0_i32 : i32, i32
  }
}

</mosaic_0001>

<bundles_post_ra>
// kernel: tpu_custom_call.1
= control target key start
LH: loop header
LB: loop body
LE: loop exit
PB: predicated region body
PF: predicated region fallthrough
CT: control target
= control target key end

     0   :  { %vm34_vm0 = vcmask 261120   ;;  %s398_s0 = inlined_call_operand.vmem [shape: f32[16,32], index: 0, kind: input, shape index: {}]   ;;  %s399_s1 = inlined_call_operand.vmem [shape: f32[32,64], index: 1, kind: input, shape index: {}]   ;;  %s400_s2 = inlined_call_operand.vmem [shape: f32[1,64], index: 2, kind: input, shape index: {}]   ;;  %s401_s3 = inlined_call_operand.vmem [shape: f32[64,32], index: 3, kind: input, shape index: {}]   ;;  %s402_s4 = inlined_call_operand.vmem [shape: f32[1,32], index: 4, kind: input, shape index: {}]   ;;  %s403_s5 = inlined_call_operand.hbm [shape: f32[16,32], index: 5, kind: output, shape index: {}]  }
   0x1   :  { %v26_v0 = vld [vmem:[%s399_s1 + $0x18] sm:$0xff]  ;;  %v25_v1 = vld [vmem:[%s399_s1 + $0x10] sm:$0xff]  ;;  %v21_v2 = vld [vmem:[%s398_s0] sm:$0xff] }
   0x2   :  { %255 = vmatprep.subr.mxu0 %v26_v0  ;;  %v24_v3 = vld [vmem:[%s399_s1 + $0x8] sm:$0xff]  ;;  %263 = vmatprep.mubr.msk.f32.mxu0 %vm34_vm0, %v21_v2  ;;  %v125_v4 = vld [vmem:[%s401_s3 + $0x38] sm:$0xff]  ;;  %v124_v5 = vld [vmem:[%s401_s3 + $0x30] sm:$0xff] }
   0x3   :  { %256 = vmatpush3.msra.mxu0 %v26_v0  ;;  %266 = vmatprep.subr.mxu1 %v125_v4 }
   0x4   :  { %257 = vmatprep.subr.mxu0 %v25_v1 }
   0x5   :  { %10 = vsyncpa [#allocation3], 0  ;;  %258 = vmatpush3.msra.mxu0 %v25_v1  ;;  %v23_v6 = vld [vmem:[%s399_s1] sm:$0xff]  ;;  %267 = vmatpush3.msra.mxu1 %v125_v4  ;;  %v123_v7 = vld [vmem:[%s401_s3 + $0x28] sm:$0xff]  ;;  %vm133_vm1 = vcmask 523264  }
   0x6   :  { %259 = vmatprep.subr.mxu0 %v24_v3  ;;  %268 = vmatprep.subr.mxu1 %v124_v5  ;;  %v22_v8 = vld [vmem:[%s398_s0 + $0x8] sm:$0xff]  ;;  %v122_v9 = vld [vmem:[%s401_s3 + $0x20] sm:$0xff]  ;;  %v121_v10 = vld [vmem:[%s401_s3 + $0x18] sm:$0xff] }
   0x7   :  { %260 = vmatpush3.msra.mxu0 %v24_v3  ;;  %269 = vmatpush3.msra.mxu1 %v124_v5  ;;  %v120_v11 = vld [vmem:[%s401_s3 + $0x10] sm:$0xff]  ;;  %v119_v12 = vld [vmem:[%s401_s3 + $0x8] sm:$0xff]  ;;  %v118_v13 = vld [vmem:[%s401_s3] sm:$0xff]  ;;  %s310_s3 = smov [#allocation2]  }
   0x8   :  { %261 = vmatprep.subr.mxu0 %v23_v6  ;;  %270 = vmatprep.subr.mxu1 %v123_v7  ;;  %v233_v14 = vld [vmem:[%s400_s2] ss:$0 sm:$0xff]  ;;  %s222_s23 = sshll.u32 %s310_s3, 4  ;;  %s223_s23 = int_to_ptr.vmem [resolvable:$true] %s222_s23 }
   0x9   :  { %262 = vmatpush3.msra.mxu0 %v23_v6  ;;  %271 = vmatpush3.msra.mxu1 %v123_v7  ;;  %v236_v21 = vld [vmem:[%s402_s4] ss:$0 sm:$0xff]  ;;  %s288_s2 = scalar_lea.vmem %s223_s23, 256  ;;  %p293_p1 = scmp.lt.s32.totalorder %s223_s23, %s223_s23 }
   0xa   :  { %264 = vmatmul.mubr.msk.f32.vlgmr.msra.gmra.mxu0 %vm34_vm0, %v22_v8  ;;  %272 = vmatprep.subr.mxu1 %v122_v9  ;;  %p289_p0 = scmp.ne.s32.totalorder %s223_s23, %s288_s2  ;;  %p294_p2 = scmp.lt.s32.totalorder %s288_s2, %s288_s2 }
   0xb   :  { %273 = vmatpush3.msra.mxu1 %v122_v9 }
   0xc   :  { %274 = vmatprep.subr.mxu1 %v121_v10  ;;  %p295_p3 = por %p294_p2, %p293_p1 }
   0xd   :  { %275 = vmatpush3.msra.mxu1 %v121_v10 }
   0xe   :  { %276 = vmatprep.subr.mxu1 %v120_v11  ;;  %p296_p4 = pnand %p295_p3, %p289_p0 }
   0xf   :  { %277 = vmatpush3.msra.mxu1 %v120_v11 }
  0x10   :  { %278 = vmatprep.subr.mxu1 %v119_v12 }
  0x11   :  { %279 = vmatpush3.msra.mxu1 %v119_v12 }
  0x12   :  { %280 = vmatprep.subr.mxu1 %v118_v13 }
  0x13   :  { %281 = vmatpush3.msra.mxu1 %v118_v13 }
  0xca   :  { %v265_v15 = vpop.f32.mrf.mxu0 }
  0xcb   :  { %v113_v16 = vadd.f32 %v265_v15, %v233_v14 }
  0xcc   :  { %v107_v17 = vpop.f32.mrf.mxu0 }
  0xcd   :  { %v108_v18 = vadd.f32 %v233_v14, %v107_v17  ;;  %v117_v20 = vmax.f32 %v113_v16, 0.0 }
  0xcf   :  { %v116_v19 = vmax.f32 %v108_v18, 0.0 }
  0xd1   :  { %282 = vmatprep.mubr.msk.f32.mxu1 %vm133_vm1, %v116_v19 }
  0xd2   :  { %283 = vmatmul.mubr.msk.f32.vlgmr.msra.gmra.mxu1 %vm133_vm1, %v117_v20 }
 0x192   :  { %v284_v22 = vpop.f32.mrf.mxu1 }
 0x193   :  { %v212_v23 = vadd.f32 %v284_v22, %v236_v21 }
 0x194   :  { %v206_v24 = vpop.f32.mrf.mxu1 }
 0x195   :  { %216 = vst.msk [vmem:[#allocation2 + $0x8] sm:$0xff] %vm34_vm0, %v212_v23  ;;  %v207_v25 = vadd.f32 %v236_v21, %v206_v24 }
 0x197   :  { %215 = vst.msk [vmem:[#allocation2] sm:$0xff] %vm34_vm0, %v207_v25 }
 0x198   :  { %299 = shalt.err (!%p296_p4)
}
 0x199   :  { %s311_s24 = smov 128   ;;  %s312_s4 = smov 8  }
 0x19a   :  { %228 = dma.vmem_to_hbm [thread:$0]  %s223_s23, 256, %s403_s5, [#allocation3], %s311_s24, %s311_s24, %s312_s4  }
 0x19b   :  { %308 = dma.done.wait [#allocation3], 256  }
 0x19c   :  { %309 = vsyncadd [#allocation3], 4294967040 }
 0x19d   :  { %232 = vsyncpa [#allocation3], 1 }

// kernel: tpu_custom_call.1
= control target key start
LH: loop header
LB: loop body
LE: loop exit
PB: predicated region body
PF: predicated region fallthrough
CT: control target
= control target key end

     0   :  { %vm34_vm0 = vcmask 261120   ;;  %s398_s0 = inlined_call_operand.vmem [shape: f32[16,32], index: 0, kind: input, shape index: {}]   ;;  %s399_s1 = inlined_call_operand.vmem [shape: f32[32,64], index: 1, kind: input, shape index: {}]   ;;  %s400_s2 = inlined_call_operand.vmem [shape: f32[1,64], index: 2, kind: input, shape index: {}]   ;;  %s401_s3 = inlined_call_operand.vmem [shape: f32[64,32], index: 3, kind: input, shape index: {}]   ;;  %s402_s4 = inlined_call_operand.vmem [shape: f32[1,32], index: 4, kind: input, shape index: {}]   ;;  %s403_s5 = inlined_call_operand.hbm [shape: f32[16,32], index: 5, kind: output, shape index: {}]  }
   0x1   :  { %v26_v0 = vld [vmem:[%s399_s1 + $0x18] sm:$0xff]  ;;  %v25_v1 = vld [vmem:[%s399_s1 + $0x10] sm:$0xff]  ;;  %v21_v2 = vld [vmem:[%s398_s0] sm:$0xff] }
   0x2   :  { %255 = vmatprep.subr.mxu0 %v26_v0  ;;  %v24_v3 = vld [vmem:[%s399_s1 + $0x8] sm:$0xff]  ;;  %263 = vmatprep.mubr.msk.f32.mxu0 %vm34_vm0, %v21_v2  ;;  %v125_v4 = vld [vmem:[%s401_s3 + $0x38] sm:$0xff]  ;;  %v124_v5 = vld [vmem:[%s401_s3 + $0x30] sm:$0xff] }
   0x3   :  { %256 = vmatpush3.msra.mxu0 %v26_v0  ;;  %266 = vmatprep.subr.mxu1 %v125_v4 }
   0x4   :  { %257 = vmatprep.subr.mxu0 %v25_v1 }
   0x5   :  { %10 = vsyncpa [#allocation3], 0  ;;  %258 = vmatpush3.msra.mxu0 %v25_v1  ;;  %v23_v6 = vld [vmem:[%s399_s1] sm:$0xff]  ;;  %267 = vmatpush3.msra.mxu1 %v125_v4  ;;  %v123_v7 = vld [vmem:[%s401_s3 + $0x28] sm:$0xff]  ;;  %vm133_vm1 = vcmask 523264  }
   0x6   :  { %259 = vmatprep.subr.mxu0 %v24_v3  ;;  %268 = vmatprep.subr.mxu1 %v124_v5  ;;  %v22_v8 = vld [vmem:[%s398_s0 + $0x8] sm:$0xff]  ;;  %v122_v9 = vld [vmem:[%s401_s3 + $0x20] sm:$0xff]  ;;  %v121_v10 = vld [vmem:[%s401_s3 + $0x18] sm:$0xff] }
   0x7   :  { %260 = vmatpush3.msra.mxu0 %v24_v3  ;;  %269 = vmatpush3.msra.mxu1 %v124_v5  ;;  %v120_v11 = vld [vmem:[%s401_s3 + $0x10] sm:$0xff]  ;;  %v119_v12 = vld [vmem:[%s401_s3 + $0x8] sm:$0xff]  ;;  %v118_v13 = vld [vmem:[%s401_s3] sm:$0xff]  ;;  %s310_s3 = smov [#allocation2]  }
   0x8   :  { %261 = vmatprep.subr.mxu0 %v23_v6  ;;  %270 = vmatprep.subr.mxu1 %v123_v7  ;;  %v233_v14 = vld [vmem:[%s400_s2] ss:$0 sm:$0xff]  ;;  %s222_s23 = sshll.u32 %s310_s3, 4  ;;  %s223_s23 = int_to_ptr.vmem [resolvable:$true] %s222_s23 }
   0x9   :  { %262 = vmatpush3.msra.mxu0 %v23_v6  ;;  %271 = vmatpush3.msra.mxu1 %v123_v7  ;;  %v236_v21 = vld [vmem:[%s402_s4] ss:$0 sm:$0xff]  ;;  %s288_s2 = scalar_lea.vmem %s223_s23, 256  ;;  %p293_p1 = scmp.lt.s32.totalorder %s223_s23, %s223_s23 }
   0xa   :  { %264 = vmatmul.mubr.msk.f32.vlgmr.msra.gmra.mxu0 %vm34_vm0, %v22_v8  ;;  %272 = vmatprep.subr.mxu1 %v122_v9  ;;  %p289_p0 = scmp.ne.s32.totalorder %s223_s23, %s288_s2  ;;  %p294_p2 = scmp.lt.s32.totalorder %s288_s2, %s288_s2 }
   0xb   :  { %273 = vmatpush3.msra.mxu1 %v122_v9 }
   0xc   :  { %274 = vmatprep.subr.mxu1 %v121_v10  ;;  %p295_p3 = por %p294_p2, %p293_p1 }
   0xd   :  { %275 = vmatpush3.msra.mxu1 %v121_v10 }
   0xe   :  { %276 = vmatprep.subr.mxu1 %v120_v11  ;;  %p296_p4 = pnand %p295_p3, %p289_p0 }
   0xf   :  { %277 = vmatpush3.msra.mxu1 %v120_v11 }
  0x10   :  { %278 = vmatprep.subr.mxu1 %v119_v12 }
  0x11   :  { %279 = vmatpush3.msra.mxu1 %v119_v12 }
  0x12   :  { %280 = vmatprep.subr.mxu1 %v118_v13 }
  0x13   :  { %281 = vmatpush3.msra.mxu1 %v118_v13 }
  0xca   :  { %v265_v15 = vpop.f32.mrf.mxu0 }
  0xcb   :  { %v113_v16 = vadd.f32 %v265_v15, %v233_v14 }
  0xcc   :  { %v107_v17 = vpop.f32.mrf.mxu0 }
  0xcd   :  { %v108_v18 = vadd.f32 %v233_v14, %v107_v17  ;;  %v117_v20 = vmax.f32 %v113_v16, 0.0 }
  0xcf   :  { %v116_v19 = vmax.f32 %v108_v18, 0.0 }
  0xd1   :  { %282 = vmatprep.mubr.msk.f32.mxu1 %vm133_vm1, %v116_v19 }
  0xd2   :  { %283 = vmatmul.mubr.msk.f32.vlgmr.msra.gmra.mxu1 %vm133_vm1, %v117_v20 }
 0x192   :  { %v284_v22 = vpop.f32.mrf.mxu1 }
 0x193   :  { %v212_v23 = vadd.f32 %v284_v22, %v236_v21 }
 0x194   :  { %v206_v24 = vpop.f32.mrf.mxu1 }
 0x195   :  { %216 = vst.msk [vmem:[#allocation2 + $0x8] sm:$0xff] %vm34_vm0, %v212_v23  ;;  %v207_v25 = vadd.f32 %v236_v21, %v206_v24 }
 0x197   :  { %215 = vst.msk [vmem:[#allocation2] sm:$0xff] %vm34_vm0, %v207_v25 }
 0x198   :  { %299 = shalt.err (!%p296_p4)
}
 0x199   :  { %s311_s24 = smov 128   ;;  %s312_s4 = smov 8  }
 0x19a   :  { %228 = dma.vmem_to_hbm [thread:$0]  %s223_s23, 256, %s403_s5, [#allocation3], %s311_s24, %s311_s24, %s312_s4  }
 0x19b   :  { %308 = dma.done.wait [#allocation3], 256  }
 0x19c   :  { %309 = vsyncadd [#allocation3], 4294967040 }
 0x19d   :  { %232 = vsyncpa [#allocation3], 1 }

</bundles_post_ra>
